<compile_context>
chip_gen: v6e
topology: v6e:2x2x1
jax: 0.10.0
libtpu: 0.0.40
codegen_flags: <defaults>
</compile_context>

<pallas_src>
import jax
import jax.numpy as jnp
from jax import lax
from jax.experimental import pallas as pl
from jax.experimental.pallas import tpu as pltpu

_LANE = 128


def _round_up(x, m):
    return ((x + m - 1) // m) * m


def _make_kernel(n_layers, in_dim, num_p, tile_n, chunk):
    def kernel(pal_ref, x_ref, *refs):
        wb = refs[: 2 * n_layers]
        raw_ref = refs[2 * n_layers]
        col_ref = refs[2 * n_layers + 1]

        def chunk_body(c, carry):
            r0 = pl.multiple_of(c * chunk, chunk)
            rows = pl.ds(r0, chunk)

            # ---------------- RFBase MLP ----------------
            # Layer 0 on the VPU: K = in_dim is tiny (2 or 4*n_freqs) -> an unrolled
            # broadcast-FMA is cheaper and shape-safe vs a degenerate MXU matmul.
            x_c = x_ref[rows, :].astype(jnp.float32)               # (chunk, in_dim)
            w0 = wb[0][...].astype(jnp.float32)                    # (in_dim, Hp)
            h = jnp.zeros((chunk, w0.shape[1]), jnp.float32) + wb[1][...].astype(jnp.float32)
            for d in range(in_dim):
                h = h + x_c[:, d:d + 1] * w0[d:d + 1, :]
            h = jnp.maximum(h, 0.0)

            # Hidden layers on the MXU (feature dims padded to 128 lanes in wrapper).
            for li in range(1, n_layers - 1):
                w = wb[2 * li][...]
                b = wb[2 * li + 1][...].astype(jnp.float32)
                h = jnp.dot(h.astype(w.dtype), w,
                            preferred_element_type=jnp.float32) + b
                h = jnp.maximum(h, 0.0)

            # Final layer (no ReLU): logits over the (lane-padded) palette axis.
            wl = wb[2 * (n_layers - 1)][...]
            bl = wb[2 * (n_layers - 1) + 1][...].astype(jnp.float32)
            logits = jnp.dot(h.astype(wl.dtype), wl,
                             preferred_element_type=jnp.float32) + bl  # (chunk, Pp)

            raw_ref[rows, :] = logits[:, :num_p].astype(raw_ref.dtype)

            # -------- RFPalette: argmax + gather as a running compare/select --------
            # Strict '>' keeps the first maximal index (torch argmax tie rule).
            best = logits[:, 0:1]
            r = jnp.full_like(best, pal_ref[0])
            g = jnp.full_like(best, pal_ref[1])
            b_ch = jnp.full_like(best, pal_ref[2])
            for p in range(1, num_p):
                lp = logits[:, p:p + 1]
                better = lp > best
                best = jnp.where(better, lp, best)
                r = jnp.where(better, pal_ref[3 * p + 0], r)
                g = jnp.where(better, pal_ref[3 * p + 1], g)
                b_ch = jnp.where(better, pal_ref[3 * p + 2], b_ch)
            col_ref[rows, :] = jnp.concatenate([r, g, b_ch], axis=-1).astype(col_ref.dtype)
            return carry

        lax.fori_loop(0, tile_n // chunk, chunk_body, 0)

    return kernel


def radiance_field_2d_palette(x, weights, biases, palette, *, tile_n=2048, chunk=64):
    """Fused forward of RadianceField2DPalette.

    x:       (N, in_dim) coordinates / posenc features
    weights: list of L arrays, weights[i]: (d_in_i, d_out_i)
    biases:  list of L arrays, biases[i]:  (d_out_i,)
    palette: (P, 3)
    Returns (raw_weights (N, P), final_color (N, 3)).
    """
    n_layers = len(weights)
    assert n_layers >= 2 and len(biases) == n_layers
    N, in_dim = x.shape
    num_p = weights[-1].shape[1]
    assert palette.shape == (num_p, 3)

    # Zero-pad every layer's OUTPUT feature dim to a multiple of 128 lanes, and each
    # subsequent layer's input dim to match.  Zero rows/cols are numerically inert
    # (ReLU(0)=0, zero weight rows) and make every MXU matmul a native shape.  The
    # padded logits columns are sliced off before the raw_weights store.
    wp, bp = [], []
    prev_out = in_dim
    for i in range(n_layers):
        w, b = weights[i], biases[i]
        d_in, d_out = w.shape
        assert d_in == (in_dim if i == 0 else weights[i - 1].shape[1])
        d_in_p = prev_out
        d_out_p = _round_up(d_out, _LANE)
        wp.append(jnp.zeros((d_in_p, d_out_p), w.dtype).at[:d_in, :d_out].set(w))
        bp.append(jnp.zeros((1, d_out_p), b.dtype).at[0, :d_out].set(b))
        prev_out = d_out_p

    # Tile selection: chunk | tile_n, both multiples of 8.  Default tile stays well
    # inside the v5e 16 MiB default scoped-VMEM budget (x/raw/color blocks, double
    # buffered, ~6.5 MiB at tile_n=2048).  When the whole problem fits one block,
    # split it so v7x's second TensorCore is not idle.
    chunk = max(8, (chunk // 8) * 8)
    tile_n = max(chunk, (min(tile_n, 4096) // chunk) * chunk)
    if N <= tile_n:
        tile_n = max(chunk, _round_up(pl.cdiv(N, 2), chunk))
    n_tiles = pl.cdiv(N, tile_n)          # ragged last block: Pallas masks it

    kernel = _make_kernel(n_layers, in_dim, num_p, tile_n, chunk)

    in_specs = [pl.BlockSpec((tile_n, in_dim), lambda i, pal: (i, 0))]
    wb_args = []
    for w_pad, b_pad in zip(wp, bp):
        in_specs.append(pl.BlockSpec(w_pad.shape, lambda i, pal: (0, 0)))
        in_specs.append(pl.BlockSpec(b_pad.shape, lambda i, pal: (0, 0)))
        wb_args.extend((w_pad, b_pad))

    out_shape = (jax.ShapeDtypeStruct((N, num_p), x.dtype),
                 jax.ShapeDtypeStruct((N, 3), palette.dtype))
    out_specs = (pl.BlockSpec((tile_n, num_p), lambda i, pal: (i, 0)),
                 pl.BlockSpec((tile_n, 3), lambda i, pal: (i, 0)))

    itm = jnp.dtype(x.dtype).itemsize
    flops = int(2 * N * (in_dim * wp[0].shape[1]
                         + sum(wp[i].shape[0] * wp[i].shape[1] for i in range(1, n_layers))))
    bytes_accessed = int(N * (in_dim + num_p) * itm
                         + N * 3 * jnp.dtype(palette.dtype).itemsize
                         + sum(int(w.size) * jnp.dtype(w.dtype).itemsize for w in wp))

    raw, color = pl.pallas_call(
        kernel,
        out_shape=out_shape,
        grid_spec=pltpu.PrefetchScalarGridSpec(
            num_scalar_prefetch=1,               # flattened palette -> SMEM scalars
            grid=(n_tiles,),
            in_specs=in_specs,
            out_specs=out_specs,
        ),
        compiler_params=pltpu.CompilerParams(
            dimension_semantics=("parallel",)),
        cost_estimate=pl.CostEstimate(flops=flops, transcendentals=0,
                                      bytes_accessed=bytes_accessed),
    )(palette.reshape(num_p * 3).astype(jnp.float32), x, *wb_args)
    return raw, color


if __name__ == "__main__":
    key = jax.random.PRNGKey(0)
    k_pal, k_x1, k_x2, *k_w = jax.random.split(key, 3 + 8)

    # Config: use_posenc=False (in_dim=2), hidden_size=32, n_layers=3,
    # palette_size=4, dropout=0.
    in_dim, hidden, palette_size = 2, 32, 4
    dims = [in_dim, hidden, hidden, palette_size]

    weights = [jax.random.normal(k_w[2 * i], (dims[i], dims[i + 1]), jnp.float32)
               * (1.0 / jnp.sqrt(dims[i])) for i in range(len(dims) - 1)]
    biases = [0.1 * jax.random.normal(k_w[2 * i + 1], (dims[i + 1],), jnp.float32)
              for i in range(len(dims) - 1)]
    palette = jax.random.uniform(k_pal, (palette_size, 3), jnp.float32, 0.0, 1.0)

    def reference(xx):
        h = xx
        for i in range(len(weights) - 1):
            h = jnp.maximum(h @ weights[i] + biases[i], 0.0)
        raw = h @ weights[-1] + biases[-1]
        return raw, palette[jnp.argmax(raw, axis=-1)]

    # Test 1: nominal small problem — a 16x16 image for a batch of 2 (N = 512 pixel
    # coordinates); exercises the >=2-grid-step split for v7x.
    x1 = jax.random.uniform(k_x1, (2 * 16 * 16, in_dim), jnp.float32, -1.0, 1.0)
    raw1, col1 = jax.block_until_ready(
        radiance_field_2d_palette(x1, weights, biases, palette))
    ref_raw1, _ = reference(x1)
    assert raw1.shape == (512, palette_size) and col1.shape == (512, 3)
    assert jnp.allclose(raw1, ref_raw1, atol=1e-4, rtol=1e-4)
    # Palette stage checked against the kernel's own logits (avoids flakiness from
    # argmax near-ties at f32 rounding differences).
    assert jnp.allclose(col1, palette[jnp.argmax(raw1, axis=-1)], atol=1e-6)

    # Test 2: ragged pixel count (not a multiple of tile/chunk) — exercises the masked
    # last grid block (no padding passes anywhere).
    x2 = jax.random.uniform(k_x2, (777, in_dim), jnp.float32, -1.0, 1.0)
    raw2, col2 = jax.block_until_ready(
        radiance_field_2d_palette(x2, weights, biases, palette, tile_n=512, chunk=64))
    ref_raw2, _ = reference(x2)
    assert raw2.shape == (777, palette_size) and col2.shape == (777, 3)
    assert jnp.allclose(raw2, ref_raw2, atol=1e-4, rtol=1e-4)
    assert jnp.allclose(col2, palette[jnp.argmax(raw2, axis=-1)], atol=1e-6)

    print("KERNEL_OK")
</pallas_src>

<mosaic_0001>
module attributes {stable_mosaic.version = 11 : i64} {
  func.func @kernel(%arg0: i32, %arg1: memref<12xf32, #tpu.memory_space<smem>>, %arg2: memref<256x2xf32, #tpu.memory_space<vmem>>, %arg3: memref<2x128xf32, #tpu.memory_space<vmem>>, %arg4: memref<1x128xf32, #tpu.memory_space<vmem>>, %arg5: memref<128x128xf32, #tpu.memory_space<vmem>>, %arg6: memref<1x128xf32, #tpu.memory_space<vmem>>, %arg7: memref<128x128xf32, #tpu.memory_space<vmem>>, %arg8: memref<1x128xf32, #tpu.memory_space<vmem>>, %arg9: memref<256x4xf32, #tpu.memory_space<vmem>>, %arg10: memref<256x3xf32, #tpu.memory_space<vmem>>) attributes {dimension_semantics = [#tpu.dimension_semantics<parallel>], iteration_bounds = array<i64: 2>, scalar_prefetch = 1 : i64, scratch_operands = 0 : i64, tpu.core_type = #tpu.core_type<tc>, window_params = [{transform_indices = @transform_0, window_bounds = array<i64: 256, 2>}, {pipeline_mode = #tpu.pipeline_mode<synchronous>, transform_indices = @transform_1, window_bounds = array<i64: 2, 128>}, {pipeline_mode = #tpu.pipeline_mode<synchronous>, transform_indices = @transform_2, window_bounds = array<i64: 1, 128>}, {pipeline_mode = #tpu.pipeline_mode<synchronous>, transform_indices = @transform_3, window_bounds = array<i64: 128, 128>}, {pipeline_mode = #tpu.pipeline_mode<synchronous>, transform_indices = @transform_4, window_bounds = array<i64: 1, 128>}, {pipeline_mode = #tpu.pipeline_mode<synchronous>, transform_indices = @transform_5, window_bounds = array<i64: 128, 128>}, {pipeline_mode = #tpu.pipeline_mode<synchronous>, transform_indices = @transform_6, window_bounds = array<i64: 1, 128>}, {transform_indices = @transform_7, window_bounds = array<i64: 256, 4>}, {transform_indices = @transform_8, window_bounds = array<i64: 256, 3>}]} {
    %c0_i32 = arith.constant 0 : i32
    %c4_i32 = arith.constant 4 : i32
    %0 = arith.addi %c0_i32, %c4_i32 : i32
    %c1_i32 = arith.constant 1 : i32
    scf.for %arg11 = %c0_i32 to %0 step %c1_i32  : i32 {
      %c64_i32 = arith.constant 64 : i32
      %1 = arith.muli %arg11, %c64_i32 : i32
      %2 = tpu.assume_multiple %1, 64 : i32
      %3 = arith.index_cast %2 : i32 to index
      %c0 = arith.constant 0 : index
      %4 = vector.load %arg2[%3, %c0] : memref<256x2xf32, #tpu.memory_space<vmem>>, vector<64x2xf32>
      %c0_1 = arith.constant 0 : index
      %c0_2 = arith.constant 0 : index
      %5 = vector.load %arg3[%c0_1, %c0_2] : memref<2x128xf32, #tpu.memory_space<vmem>>, vector<2x128xf32>
      %cst = arith.constant 0.000000e+00 : f32
      %6 = vector.broadcast %cst : f32 to vector<64x128xf32>
      %c0_3 = arith.constant 0 : index
      %c0_4 = arith.constant 0 : index
      %7 = vector.load %arg4[%c0_3, %c0_4] : memref<1x128xf32, #tpu.memory_space<vmem>>, vector<1x128xf32>
      %8 = vector.broadcast %7 : vector<1x128xf32> to vector<64x128xf32>
      %9 = arith.addf %6, %8 : vector<64x128xf32>
      %10 = vector.extract_strided_slice %4 {offsets = [0, 0], sizes = [64, 1], strides = [1, 1]} : vector<64x2xf32> to vector<64x1xf32>
      %11 = vector.extract_strided_slice %5 {offsets = [0, 0], sizes = [1, 128], strides = [1, 1]} : vector<2x128xf32> to vector<1x128xf32>
      %12 = vector.broadcast %10 : vector<64x1xf32> to vector<64x128xf32>
      %13 = vector.broadcast %11 : vector<1x128xf32> to vector<64x128xf32>
      %14 = arith.mulf %12, %13 : vector<64x128xf32>
      %15 = arith.addf %9, %14 : vector<64x128xf32>
      %16 = vector.extract_strided_slice %4 {offsets = [0, 1], sizes = [64, 1], strides = [1, 1]} : vector<64x2xf32> to vector<64x1xf32>
      %17 = vector.extract_strided_slice %5 {offsets = [1, 0], sizes = [1, 128], strides = [1, 1]} : vector<2x128xf32> to vector<1x128xf32>
      %18 = vector.broadcast %16 : vector<64x1xf32> to vector<64x128xf32>
      %19 = vector.broadcast %17 : vector<1x128xf32> to vector<64x128xf32>
      %20 = arith.mulf %18, %19 : vector<64x128xf32>
      %21 = arith.addf %15, %20 : vector<64x128xf32>
      %cst_5 = arith.constant 0.000000e+00 : f32
      %22 = vector.broadcast %cst_5 : f32 to vector<64x128xf32>
      %23 = arith.maximumf %21, %22 : vector<64x128xf32>
      %c0_6 = arith.constant 0 : index
      %c0_7 = arith.constant 0 : index
      %24 = vector.load %arg5[%c0_6, %c0_7] : memref<128x128xf32, #tpu.memory_space<vmem>>, vector<128x128xf32>
      %c0_8 = arith.constant 0 : index
      %c0_9 = arith.constant 0 : index
      %25 = vector.load %arg6[%c0_8, %c0_9] : memref<1x128xf32, #tpu.memory_space<vmem>>, vector<1x128xf32>
      %cst_10 = arith.constant dense<0.000000e+00> : vector<64x128xf32>
      %26 = tpu.matmul %23, %24, %cst_10 {dimension_numbers = #tpu.dot_dimension_numbers<[1], [0], [0], [1], [0, 0, 1, 1], [], []>} : vector<64x128xf32>, vector<128x128xf32>, vector<64x128xf32> -> vector<64x128xf32>
      %27 = vector.broadcast %25 : vector<1x128xf32> to vector<64x128xf32>
      %28 = arith.addf %26, %27 : vector<64x128xf32>
      %cst_11 = arith.constant 0.000000e+00 : f32
      %29 = vector.broadcast %cst_11 : f32 to vector<64x128xf32>
      %30 = arith.maximumf %28, %29 : vector<64x128xf32>
      %c0_12 = arith.constant 0 : index
      %c0_13 = arith.constant 0 : index
      %31 = vector.load %arg7[%c0_12, %c0_13] : memref<128x128xf32, #tpu.memory_space<vmem>>, vector<128x128xf32>
      %c0_14 = arith.constant 0 : index
      %c0_15 = arith.constant 0 : index
      %32 = vector.load %arg8[%c0_14, %c0_15] : memref<1x128xf32, #tpu.memory_space<vmem>>, vector<1x128xf32>
      %cst_16 = arith.constant dense<0.000000e+00> : vector<64x128xf32>
      %33 = tpu.matmul %30, %31, %cst_16 {dimension_numbers = #tpu.dot_dimension_numbers<[1], [0], [0], [1], [0, 0, 1, 1], [], []>} : vector<64x128xf32>, vector<128x128xf32>, vector<64x128xf32> -> vector<64x128xf32>
      %34 = vector.broadcast %32 : vector<1x128xf32> to vector<64x128xf32>
      %35 = arith.addf %33, %34 : vector<64x128xf32>
      %36 = vector.extract_strided_slice %35 {offsets = [0, 0], sizes = [64, 4], strides = [1, 1]} : vector<64x128xf32> to vector<64x4xf32>
      %37 = arith.index_cast %2 : i32 to index
      %c0_17 = arith.constant 0 : index
      %38 = vector.load %arg9[%37, %c0_17] : memref<256x4xf32, #tpu.memory_space<vmem>>, vector<64x4xf32>
      tpu.vector_store %arg9[%37, %c0_17], %36 {strides = array<i32>} : memref<256x4xf32, #tpu.memory_space<vmem>>, vector<64x4xf32>,
      %39 = vector.extract_strided_slice %35 {offsets = [0, 0], sizes = [64, 1], strides = [1, 1]} : vector<64x128xf32> to vector<64x1xf32>
      %c0_18 = arith.constant 0 : index
      %40 = memref.load %arg1[%c0_18] : memref<12xf32, #tpu.memory_space<smem>>
      %41 = vector.broadcast %40 : f32 to vector<64x1xf32>
      %c1 = arith.constant 1 : index
      %42 = memref.load %arg1[%c1] : memref<12xf32, #tpu.memory_space<smem>>
      %43 = vector.broadcast %42 : f32 to vector<64x1xf32>
      %c2 = arith.constant 2 : index
      %44 = memref.load %arg1[%c2] : memref<12xf32, #tpu.memory_space<smem>>
      %45 = vector.broadcast %44 : f32 to vector<64x1xf32>
      %46 = vector.extract_strided_slice %35 {offsets = [0, 1], sizes = [64, 1], strides = [1, 1]} : vector<64x128xf32> to vector<64x1xf32>
      %47 = arith.cmpf ogt, %46, %39 : vector<64x1xf32>
      %48 = arith.select %47, %46, %39 : vector<64x1xi1>, vector<64x1xf32>
      %c3 = arith.constant 3 : index
      %49 = memref.load %arg1[%c3] : memref<12xf32, #tpu.memory_space<smem>>
      %50 = vector.broadcast %49 : f32 to vector<64x1xf32>
      %51 = arith.select %47, %50, %41 : vector<64x1xi1>, vector<64x1xf32>
      %c4 = arith.constant 4 : index
      %52 = memref.load %arg1[%c4] : memref<12xf32, #tpu.memory_space<smem>>
      %53 = vector.broadcast %52 : f32 to vector<64x1xf32>
      %54 = arith.select %47, %53, %43 : vector<64x1xi1>, vector<64x1xf32>
      %c5 = arith.constant 5 : index
      %55 = memref.load %arg1[%c5] : memref<12xf32, #tpu.memory_space<smem>>
      %56 = vector.broadcast %55 : f32 to vector<64x1xf32>
      %57 = arith.select %47, %56, %45 : vector<64x1xi1>, vector<64x1xf32>
      %58 = vector.extract_strided_slice %35 {offsets = [0, 2], sizes = [64, 1], strides = [1, 1]} : vector<64x128xf32> to vector<64x1xf32>
      %59 = arith.cmpf ogt, %58, %48 : vector<64x1xf32>
      %60 = arith.select %59, %58, %48 : vector<64x1xi1>, vector<64x1xf32>
      %c6 = arith.constant 6 : index
      %61 = memref.load %arg1[%c6] : memref<12xf32, #tpu.memory_space<smem>>
      %62 = vector.broadcast %61 : f32 to vector<64x1xf32>
      %63 = arith.select %59, %62, %51 : vector<64x1xi1>, vector<64x1xf32>
      %c7 = arith.constant 7 : index
      %64 = memref.load %arg1[%c7] : memref<12xf32, #tpu.memory_space<smem>>
      %65 = vector.broadcast %64 : f32 to vector<64x1xf32>
      %66 = arith.select %59, %65, %54 : vector<64x1xi1>, vector<64x1xf32>
      %c8 = arith.constant 8 : index
      %67 = memref.load %arg1[%c8] : memref<12xf32, #tpu.memory_space<smem>>
      %68 = vector.broadcast %67 : f32 to vector<64x1xf32>
      %69 = arith.select %59, %68, %57 : vector<64x1xi1>, vector<64x1xf32>
      %70 = vector.extract_strided_slice %35 {offsets = [0, 3], sizes = [64, 1], strides = [1, 1]} : vector<64x128xf32> to vector<64x1xf32>
      %71 = arith.cmpf ogt, %70, %60 : vector<64x1xf32>
      %c9 = arith.constant 9 : index
      %72 = memref.load %arg1[%c9] : memref<12xf32, #tpu.memory_space<smem>>
      %73 = vector.broadcast %72 : f32 to vector<64x1xf32>
      %74 = arith.select %71, %73, %63 : vector<64x1xi1>, vector<64x1xf32>
      %c10 = arith.constant 10 : index
      %75 = memref.load %arg1[%c10] : memref<12xf32, #tpu.memory_space<smem>>
      %76 = vector.broadcast %75 : f32 to vector<64x1xf32>
      %77 = arith.select %71, %76, %66 : vector<64x1xi1>, vector<64x1xf32>
      %c11 = arith.constant 11 : index
      %78 = memref.load %arg1[%c11] : memref<12xf32, #tpu.memory_space<smem>>
      %79 = vector.broadcast %78 : f32 to vector<64x1xf32>
      %80 = arith.select %71, %79, %69 : vector<64x1xi1>, vector<64x1xf32>
      %81 = tpu.concatenate %74, %77, %80 in 1 : vector<64x1xf32>, vector<64x1xf32>, vector<64x1xf32> -> vector<64x3xf32>
      %82 = arith.index_cast %2 : i32 to index
      %c0_19 = arith.constant 0 : index
      %83 = vector.load %arg10[%82, %c0_19] : memref<256x3xf32, #tpu.memory_space<vmem>>, vector<64x3xf32>
      tpu.vector_store %arg10[%82, %c0_19], %81 {strides = array<i32>} : memref<256x3xf32, #tpu.memory_space<vmem>>, vector<64x3xf32>,
    }
    %c4_i32_0 = arith.constant 4 : i32
    return
  }
  func.func @transform_0(%arg0: i32, %arg1: memref<12xf32, #tpu.memory_space<smem>>) -> (i32, i32) {
    %c0_i32 = arith.constant 0 : i32
    %c0_i32_0 = arith.constant 0 : i32
    return %arg0, %c0_i32 : i32, i32
  }
  func.func @transform_1(%arg0: i32, %arg1: memref<12xf32, #tpu.memory_space<smem>>) -> (i32, i32) {
    %c0_i32 = arith.constant 0 : i32
    %c0_i32_0 = arith.constant 0 : i32
    %c0_i32_1 = arith.constant 0 : i32
    return %c0_i32, %c0_i32_0 : i32, i32
  }
  func.func @transform_2(%arg0: i32, %arg1: memref<12xf32, #tpu.memory_space<smem>>) -> (i32, i32) {
    %c0_i32 = arith.constant 0 : i32
    %c0_i32_0 = arith.constant 0 : i32
    %c0_i32_1 = arith.constant 0 : i32
    return %c0_i32, %c0_i32_0 : i32, i32
  }
  func.func @transform_3(%arg0: i32, %arg1: memref<12xf32, #tpu.memory_space<smem>>) -> (i32, i32) {
    %c0_i32 = arith.constant 0 : i32
    %c0_i32_0 = arith.constant 0 : i32
    %c0_i32_1 = arith.constant 0 : i32
    return %c0_i32, %c0_i32_0 : i32, i32
  }
  func.func @transform_4(%arg0: i32, %arg1: memref<12xf32, #tpu.memory_space<smem>>) -> (i32, i32) {
    %c0_i32 = arith.constant 0 : i32
    %c0_i32_0 = arith.constant 0 : i32
    %c0_i32_1 = arith.constant 0 : i32
    return %c0_i32, %c0_i32_0 : i32, i32
  }
  func.func @transform_5(%arg0: i32, %arg1: memref<12xf32, #tpu.memory_space<smem>>) -> (i32, i32) {
    %c0_i32 = arith.constant 0 : i32
    %c0_i32_0 = arith.constant 0 : i32
    %c0_i32_1 = arith.constant 0 : i32
    return %c0_i32, %c0_i32_0 : i32, i32
  }
  func.func @transform_6(%arg0: i32, %arg1: memref<12xf32, #tpu.memory_space<smem>>) -> (i32, i32) {
    %c0_i32 = arith.constant 0 : i32
    %c0_i32_0 = arith.constant 0 : i32
    %c0_i32_1 = arith.constant 0 : i32
    return %c0_i32, %c0_i32_0 : i32, i32
  }
  func.func @transform_7(%arg0: i32, %arg1: memref<12xf32, #tpu.memory_space<smem>>) -> (i32, i32) {
    %c0_i32 = arith.constant 0 : i32
    %c0_i32_0 = arith.constant 0 : i32
    return %arg0, %c0_i32 : i32, i32
  }
  func.func @transform_8(%arg0: i32, %arg1: memref<12xf32, #tpu.memory_space<smem>>) -> (i32, i32) {
    %c0_i32 = arith.constant 0 : i32
    %c0_i32_0 = arith.constant 0 : i32
    return %arg0, %c0_i32 : i32, i32
  }
}

</mosaic_0001>

<bundles_post_ra>
// kernel: tpu_custom_call.1
= control target key start
LH: loop header
LB: loop body
LE: loop exit
PB: predicated region body
PF: predicated region fallthrough
CT: control target
= control target key end

     0   :  { %s2343_s0 = inlined_call_operand.vmem [shape: f32[12], index: 0, kind: input, shape index: {}]   ;;  %s2344_s1 = inlined_call_operand.vmem [shape: f32[512,2], index: 1, kind: input, shape index: {}]   ;;  %s2345_s2 = inlined_call_operand.vmem [shape: f32[2,128], index: 2, kind: input, shape index: {}]   ;;  %s2346_s3 = inlined_call_operand.vmem [shape: f32[1,128], index: 3, kind: input, shape index: {}]   ;;  %s2347_s4 = inlined_call_operand.vmem [shape: f32[128,128], index: 4, kind: input, shape index: {}]   ;;  %s2348_s5 = inlined_call_operand.vmem [shape: f32[1,128], index: 5, kind: input, shape index: {}]   ;;  %s2349_s6 = inlined_call_operand.vmem [shape: f32[128,128], index: 6, kind: input, shape index: {}]   ;;  %s2350_s7 = inlined_call_operand.vmem [shape: f32[1,128], index: 7, kind: input, shape index: {}]   ;;  %s2351_s8 = inlined_call_operand.vmem [shape: f32[512,4], index: 8, kind: output, shape index: {0}]   ;;  %s2352_s9 = inlined_call_operand.vmem [shape: f32[512,3], index: 9, kind: output, shape index: {1}]  }
   0x1   :  { %s15_s11 = sshll.u32 %s2343_s0, 4  ;;  %s16_s11 = int_to_ptr.vmem [resolvable:$true] %s15_s11 }
   0x2   :  { %s1595_s12 = scalar_lea.vmem %s16_s11, 16  ;;  %p1600_p1 = scmp.lt.s32.totalorder %s16_s11, %s16_s11 }
   0x3   :  { %p1596_p0 = scmp.ne.s32.totalorder %s16_s11, %s1595_s12  ;;  %p1601_p2 = scmp.lt.s32.totalorder %s1595_s12, %s1595_s12 }
   0x5   :  { %p1602_p3 = por %p1601_p2, %p1600_p1 }
   0x7   :  { %p1603_p4 = pnand %p1602_p3, %p1596_p0 }
   0x9   :  { %1606 = shalt.err (!%p1603_p4)  }
   0xa   :  { %s1625_s13 = smov [#allocation3]  }
   0xb   :  { %18 = dma.vmem_to_smem %s16_s11, 16, %s1625_s13, [#allocation2] }
   0xc   :  { %1615 = dma.done.wait [#allocation2], 16 }
   0xd   :  { %1616 = vsyncadd [#allocation2], 4294967280 }
   0xe   :  { %20 = sfence }
   0xf   :  { %s1685_s14 = smov 0  }
  0x10 LB: > { %s1398_s0 = sadd.s32 4294967295, %s1619_s14   ;;  %p1402_p5 = scmp.ge.s32.totalorder %s1619_s14, 1  ;;  %s1619_s14 = sphi %s1685_s14, %s26_s14  }
  0x11   : > { %p273_p6 = scmp.lt.s32.totalorder %s1619_s14, 3 }
  0x13   : > { %p274_p7 = pnand %p1402_p5, %p273_p6 }
  0x14   : > { %s1403_s15 = sshll.u32 (!%p274_p7), %s1398_s0, 5  ;;  %s1707_s26 = smov (!%p274_p7), 0  }
  0x15   : > { %277 = sbr.rel (%p274_p7) target bundleno = 1099 (0x44b), region = 48  ;;  %p313_p8 = scmp.lt.s32.totalorder (!%p274_p7), %s1403_s15, 63 }
  0x1a   : > { %s2354_s15 = smov (!%p313_p8, %s1403_s15), 63 }
  0x1b   : > { %s1693_s16 = sshll.u32 %s2354_s15, 3 }
  0x1c   : > { %s316_s19 = scalar_lea.vmem %s2344_s1, %s1693_s16  ;;  %s322_s22 = scalar_lea.vmem %s2351_s8, %s1693_s16 }
  0x1d   : > { %s328_s25 = scalar_lea.vmem %s2352_s9, %s1693_s16 }
  0x1e LB: >> { %v490_v0 = vld [vmem:[%s2347_s4 + $0x78] sm:$0xff]  ;;  %v1626_v1 = vmov 1   ;;  %v489_v2 = vld [vmem:[%s2347_s4 + $0x70] sm:$0xff]  ;;  %s1721_s10 = sshll.u32 %s1623_s26, 6  ;;  %v488_v5 = vld [vmem:[%s2347_s4 + $0x68] sm:$0xff]  ;;  %v1627_v8 = vmov 0   ;;  %v395_v38 = vlaneseq  ;;  %s1623_s26 = sphi %s1707_s26, %s335_s26  }
  0x1f   : >> { %1587 = vset.pattern.permute.xlu0 %v1626_v1  ;;  %1585 = vset.pattern.permute.xlu1 %v1626_v1  ;;  %s1729_s13 = scalar_lea.vmem %s316_s19, %s1721_s10  ;;  %v487_v7 = vld [vmem:[%s2347_s4 + $0x60] sm:$0xff]  ;;  %v486_v9 = vld [vmem:[%s2347_s4 + $0x58] sm:$0xff]  ;;  %v485_v11 = vld [vmem:[%s2347_s4 + $0x50] sm:$0xff]  ;;  %s1851_s30 = scalar_lea.vmem %s322_s22, %s1721_s10  ;;  %vm740_vm0 = vcmask 31744  }
  0x20   : >> { %1474 = vmatprep.subr.mxu0 %v490_v0  ;;  %v340_v3 = vld [vmem:[%s1729_s13 + $0x10] sm:$0xff]  ;;  %v338_v4 = vld [vmem:[%s1729_s13] sm:$0xff]  ;;  %v339_v6 = vld [vmem:[%s1729_s13 + $0x8] sm:$0xff]  ;;  %v396_v39 = vshrl.u32 %v395_v38, 7  ;;  %s1628_s11 = smov 1   ;;  %s749_s12 = sld [smem:[#allocation3]] }
  0x21   : >> { %1475 = vmatpush3.msra.mxu0 %v490_v0  ;;  %424 = vperm.xlu0 %1587, %v340_v3   ;;  %v341_v10 = vld [vmem:[%s1729_s13 + $0x18] sm:$0xff]  ;;  %v484_v12 = vld [vmem:[%s2347_s4 + $0x48] sm:$0xff]  ;;  %v483_v13 = vld [vmem:[%s2347_s4 + $0x40] sm:$0xff]  ;;  %s1415_s0 = sld [smem:[#allocation3 + $0x3]]  ;;  %s1629_s29 = smov 125  }
  0x22   : >> { %1476 = vmatprep.subr.mxu0 %v489_v2  ;;  %416 = vperm.xlu1 %1585, %v338_v4   ;;  %v343_v14 = vld [vmem:[%s1729_s13 + $0x28] sm:$0xff]  ;;  %v482_v15 = vld [vmem:[%s2347_s4 + $0x38] sm:$0xff]  ;;  %v342_v16 = vld [vmem:[%s1729_s13 + $0x20] sm:$0xff]  ;;  %v397_v40 = vsub.s32 0, %v396_v39  ;;  %v449_v41 = vsub.s32 1, %v396_v39  ;;  %s1413_s15 = sld [smem:[#allocation3 + $0x1]] }
  0x23   : >> { %1477 = vmatpush3.msra.mxu0 %v489_v2  ;;  %v481_v17 = vld [vmem:[%s2347_s4 + $0x30] sm:$0xff]  ;;  %v480_v19 = vld [vmem:[%s2347_s4 + $0x28] sm:$0xff]  ;;  %v479_v20 = vld [vmem:[%s2347_s4 + $0x20] sm:$0xff]  ;;  %s1416_s17 = sld [smem:[#allocation3 + $0x4]]  ;;  %s335_s26 = sadd.s32 1, %s1623_s26  }
  0x24   : >> { %1478 = vmatprep.subr.mxu0 %v488_v5  ;;  %v344_v18 = vld [vmem:[%s1729_s13 + $0x30] sm:$0xff]  ;;  %v478_v21 = vld [vmem:[%s2347_s4 + $0x18] sm:$0xff]  ;;  %v476_v23 = vld [vmem:[%s2347_s4 + $0x8] sm:$0xff]  ;;  %s1414_s18 = sld [smem:[#allocation3 + $0x2]]  ;;  %p332_p9 = scmp.ge.s32.totalorder %s335_s26, 4  }
  0x25   : >> { %1479 = vmatpush3.msra.mxu0 %v488_v5  ;;  %1588 = vset.pattern.permute.xlu0 %v1627_v8  ;;  %v477_v22 = vld [vmem:[%s2347_s4 + $0x10] sm:$0xff]  ;;  %v475_v24 = vld [vmem:[%s2347_s4] sm:$0xff]  ;;  %v345_v25 = vld [vmem:[%s1729_s13 + $0x38] sm:$0xff]  ;;  %s1417_s20 = sld [smem:[#allocation3 + $0x5]] }
  0x26   : >> { %420 = vperm.xlu1 %1585, %v339_v6   ;;  %357 = vperm.xlu0 %1588, %v338_v4   ;;  %v626_v26 = vld [vmem:[%s2349_s6 + $0x78] sm:$0xff]  ;;  %v625_v27 = vld [vmem:[%s2349_s6 + $0x70] sm:$0xff]  ;;  %v624_v28 = vld [vmem:[%s2349_s6 + $0x68] sm:$0xff]  ;;  %s1418_s13 = sld [smem:[#allocation3 + $0x6]] }
  0x27   : >> { %1480 = vmatprep.subr.mxu0 %v487_v7  ;;  %1518 = vmatprep.subr.mxu1 %v626_v26  ;;  %v623_v29 = vld [vmem:[%s2349_s6 + $0x60] sm:$0xff]  ;;  %v622_v30 = vld [vmem:[%s2349_s6 + $0x58] sm:$0xff]  ;;  %v621_v31 = vld [vmem:[%s2349_s6 + $0x50] sm:$0xff]  ;;  %s1419_s21 = sld [smem:[#allocation3 + $0x7]] }
  0x28   : >> { %1481 = vmatpush3.msra.mxu0 %v487_v7  ;;  %1519 = vmatpush3.msra.mxu1 %v626_v26  ;;  %v620_v32 = vld [vmem:[%s2349_s6 + $0x48] sm:$0xff]  ;;  %v619_v33 = vld [vmem:[%s2349_s6 + $0x40] sm:$0xff]  ;;  %v618_v34 = vld [vmem:[%s2349_s6 + $0x38] sm:$0xff]  ;;  %s1420_s23 = sld [smem:[#allocation3 + $0x8]] }
  0x29   : >> { %1482 = vmatprep.subr.mxu0 %v486_v9  ;;  %1520 = vmatprep.subr.mxu1 %v625_v27  ;;  %v617_v35 = vld [vmem:[%s2349_s6 + $0x30] sm:$0xff]  ;;  %v616_v36 = vld [vmem:[%s2349_s6 + $0x28] sm:$0xff]  ;;  %v615_v37 = vld [vmem:[%s2349_s6 + $0x20] sm:$0xff]  ;;  %s1421_s24 = sld [smem:[#allocation3 + $0x9]] }
  0x2a   : >> { %1586 = vset.pattern.permute.xlu1 %v1627_v8  ;;  %1483 = vmatpush3.msra.mxu0 %v486_v9  ;;  %v346_v44 = vld [vmem:[%s2345_s2] sm:$0x3]  ;;  %v614_v38 = vld [vmem:[%s2349_s6 + $0x18] sm:$0xff]  ;;  %v613_v39 = vld [vmem:[%s2349_s6 + $0x10] sm:$0xff]  ;;  %s1422_s27 = sld [smem:[#allocation3 + $0xa]] }
  0x2b   : >> { %362 = vperm.xlu0 %1588, %v339_v6   ;;  %372 = vperm.xlu1 %1586, %v341_v10   ;;  %v398_v45 = vrot.slane %v346_v44, %v397_v40  ;;  %v450_v46 = vrot.slane %v346_v44, %v449_v41  ;;  %v1410_v49 = vld [vmem:[%s2346_s3] ss:$0 sm:$0xff]  ;;  %v612_v40 = vld [vmem:[%s2349_s6 + $0x8] sm:$0xff]  ;;  %s1423_s28 = sld [smem:[#allocation3 + $0xb]] }
  0x2c   : >> { %1484 = vmatprep.subr.mxu0 %v485_v11  ;;  %1521 = vmatpush3.msra.mxu1 %v625_v27  ;;  %v611_v41 = vld [vmem:[%s2349_s6] sm:$0xff] }
  0x2d   : >> { %1485 = vmatpush3.msra.mxu0 %v485_v11  ;;  %1522 = vmatprep.subr.mxu1 %v624_v28 }
  0x2e   : >> { %1486 = vmatprep.subr.mxu0 %v484_v12  ;;  %1523 = vmatpush3.msra.mxu1 %v624_v28 }
  0x2f   : >> { %367 = vperm.xlu0 %1588, %v340_v3   ;;  %1589 = vset.pattern.permute.xlu1 %v1626_v1 }
  0x30   : >> { %428 = vperm.xlu1 %1589, %v341_v10   ;;  %1487 = vmatpush3.msra.mxu0 %v484_v12 }
  0x31   : >> { %1488 = vmatprep.subr.mxu0 %v483_v13  ;;  %1524 = vmatprep.subr.mxu1 %v623_v29 }
  0x32   : >> { %1489 = vmatpush3.msra.mxu0 %v483_v13  ;;  %1525 = vmatpush3.msra.mxu1 %v623_v29 }
  0x33   : >> { %382 = vperm.xlu0 %1588, %v343_v14   ;;  %1490 = vmatprep.subr.mxu0 %v482_v15 }
  0x34   : >> { %1590 = vset.pattern.permute.xlu1 %v1627_v8  ;;  %1491 = vmatpush3.msra.mxu0 %v482_v15 }
  0x35   : >> { %377 = vperm.xlu1 %1590, %v342_v16   ;;  %1492 = vmatprep.subr.mxu0 %v481_v17 }
  0x36   : >> { %1493 = vmatpush3.msra.mxu0 %v481_v17  ;;  %1526 = vmatprep.subr.mxu1 %v622_v30 }
  0x37   : >> { %387 = vperm.xlu0 %1588, %v344_v18   ;;  %1494 = vmatprep.subr.mxu0 %v480_v19 }
  0x38   : >> { %1495 = vmatpush3.msra.mxu0 %v480_v19  ;;  %1527 = vmatpush3.msra.mxu1 %v622_v30 }
  0x39   : >> { %1591 = vset.pattern.permute.xlu1 %v1626_v1  ;;  %1496 = vmatprep.subr.mxu0 %v479_v20 }
  0x3a   : >> { %432 = vperm.xlu1 %1591, %v342_v16   ;;  %1497 = vmatpush3.msra.mxu0 %v479_v20 }
  0x3b   : >> { %1593 = vset.pattern.permute.xlu0 %v1626_v1  ;;  %1498 = vmatprep.subr.mxu0 %v478_v21 }
  0x3c   : >> { %440 = vperm.xlu0 %1593, %v344_v18   ;;  %1499 = vmatpush3.msra.mxu0 %v478_v21 }
  0x3d   : >> { %1500 = vmatprep.subr.mxu0 %v477_v22  ;;  %1528 = vmatprep.subr.mxu1 %v621_v31 }
  0x3e   : >> { %436 = vperm.xlu1 %1591, %v343_v14   ;;  %1501 = vmatpush3.msra.mxu0 %v477_v22 }
  0x3f   : >> { %1502 = vmatprep.subr.mxu0 %v476_v23  ;;  %1529 = vmatpush3.msra.mxu1 %v621_v31 }
  0x40   : >> { %1503 = vmatpush3.msra.mxu0 %v476_v23  ;;  %1530 = vmatprep.subr.mxu1 %v620_v32 }
  0x41   : >> { %1504 = vmatprep.subr.mxu0 %v475_v24  ;;  %1531 = vmatpush3.msra.mxu1 %v620_v32 }
  0x42   : >> { %1592 = vset.pattern.permute.xlu1 %v1627_v8  ;;  %1505 = vmatpush3.msra.mxu0 %v475_v24 }
  0x43   : >> { %392 = vperm.xlu1 %1592, %v345_v25   ;;  %1532 = vmatprep.subr.mxu1 %v619_v33 }
  0x44   : >> { %1533 = vmatpush3.msra.mxu1 %v619_v33 }
  0x45   : >> { %1534 = vmatprep.subr.mxu1 %v618_v34 }
  0x46   : >> { %1535 = vmatpush3.msra.mxu1 %v618_v34 }
  0x47   : >> { %1594 = vset.pattern.permute.xlu1 %v1626_v1  ;;  %1536 = vmatprep.subr.mxu1 %v617_v35 }
  0x48   : >> { %444 = vperm.xlu1 %1594, %v345_v25   ;;  %1537 = vmatpush3.msra.mxu1 %v617_v35 }
  0x49   : >> { %1538 = vmatprep.subr.mxu1 %v616_v36 }
  0x4a   : >> { %1539 = vmatpush3.msra.mxu1 %v616_v36 }
  0x4b   : >> { %1540 = vmatprep.subr.mxu1 %v615_v37 }
  0x4c   : >> { %1541 = vmatpush3.msra.mxu1 %v615_v37 }
  0x4d   : >> { %1542 = vmatprep.subr.mxu1 %v614_v38 }
  0x4e   : >> { %1543 = vmatpush3.msra.mxu1 %v614_v38 }
  0x4f   : >> { %1544 = vmatprep.subr.mxu1 %v613_v39 }
  0x50   : >> { %1545 = vmatpush3.msra.mxu1 %v613_v39 }
  0x51   : >> { %1546 = vmatprep.subr.mxu1 %v612_v40 }
  0x52   : >> { %1547 = vmatpush3.msra.mxu1 %v612_v40 }
  0x53   : >> { %1548 = vmatprep.subr.mxu1 %v611_v41 }
  0x54   : >> { %1549 = vmatpush3.msra.mxu1 %v611_v41 }
  0x9c   : >> { %v425_v42 = vpop.permute.xlu0 %424 }
  0x9d   : >> { %v417_v43 = vpop.permute.xlu1 %416  ;;  %v453_v3 = vmul.f32 %v450_v46, %v425_v42  ;;  %v1411_v42 = vld [vmem:[%s2348_s5] ss:$0 sm:$0xff] }
  0x9e   : >> { %v451_v50 = vmul.f32 %v450_v46, %v417_v43 }
  0xa1   : >> { %v421_v47 = vpop.permute.xlu1 %420  ;;  %v358_v48 = vpop.permute.xlu0 %357 }
  0xa2   : >> { %v399_v51 = vmul.f32 %v398_v45, %v358_v48  ;;  %v452_v58 = vmul.f32 %v450_v46, %v421_v47 }
  0xa4   : >> { %v407_v52 = vadd.f32 %v1410_v49, %v399_v51 }
  0xa6   : >> { %v363_v53 = vpop.permute.xlu0 %362  ;;  %v373_v54 = vpop.permute.xlu1 %372  ;;  %v459_v57 = vadd.f32 %v451_v50, %v407_v52 }
  0xa7   : >> { %v400_v55 = vmul.f32 %v398_v45, %v363_v53  ;;  %v402_v56 = vmul.f32 %v398_v45, %v373_v54 }
  0xa8   : >> { %v467_v60 = vmax.f32 %v459_v57, 0.0 }
  0xa9   : >> { %v408_v59 = vadd.f32 %v1410_v49, %v400_v55  ;;  %v410_v61 = vadd.f32 %v1410_v49, %v402_v56 }
  0xaa   : >> { %v368_v62 = vpop.permute.xlu0 %367  ;;  %1506 = vmatprep.mubr.f32.mxu0 %v467_v60 }
  0xab   : >> { %v401_v63 = vmul.f32 %v398_v45, %v368_v62  ;;  %v429_v0 = vpop.permute.xlu1 %428  ;;  %v460_v1 = vadd.f32 %v452_v58, %v408_v59 }
  0xac   : >> { %v454_v2 = vmul.f32 %v450_v46, %v429_v0 }
  0xad   : >> { %v409_v4 = vadd.f32 %v1410_v49, %v401_v63  ;;  %v468_v5 = vmax.f32 %v460_v1, 0.0 }
  0xae   : >> { %v462_v6 = vadd.f32 %v454_v2, %v410_v61  ;;  %v383_v7 = vpop.permute.xlu0 %382 }
  0xaf   : >> { %1507 = vmatmul.mubr.f32.vlgmr.msra.gmra.mxu0 %v468_v5  ;;  %v461_v8 = vadd.f32 %v453_v3, %v409_v4  ;;  %v404_v17 = vmul.f32 %v398_v45, %v383_v7  ;;  %v1412_v3 = vld [vmem:[%s2350_s7] ss:$0 sm:$0xff] }
  0xb0   : >> { %v378_v9 = vpop.permute.xlu1 %377  ;;  %v470_v10 = vmax.f32 %v462_v6, 0.0 }
  0xb1   : >> { %v403_v11 = vmul.f32 %v398_v45, %v378_v9  ;;  %v469_v12 = vmax.f32 %v461_v8, 0.0  ;;  %v412_v24 = vadd.f32 %v1410_v49, %v404_v17 }
  0xb2   : >> { %v388_v13 = vpop.permute.xlu0 %387 }
  0xb3   : >> { %1509 = vmatprep.mubr.f32.mxu0 %v469_v12  ;;  %v411_v14 = vadd.f32 %v1410_v49, %v403_v11  ;;  %v405_v15 = vmul.f32 %v398_v45, %v388_v13 }
  0xb4   : >> { %1510 = vmatmul.mubr.f32.gmra.mxu0 %v470_v10 }
  0xb5   : >> { %v433_v16 = vpop.permute.xlu1 %432  ;;  %v413_v22 = vadd.f32 %v1410_v49, %v405_v15 }
  0xb6   : >> { %v455_v18 = vmul.f32 %v450_v46, %v433_v16 }
  0xb7   : >> { %v441_v19 = vpop.permute.xlu0 %440 }
  0xb8   : >> { %v463_v20 = vadd.f32 %v455_v18, %v411_v14  ;;  %v457_v21 = vmul.f32 %v450_v46, %v441_v19 }
  0xb9   : >> { %v437_v23 = vpop.permute.xlu1 %436 }
  0xba   : >> { %v456_v25 = vmul.f32 %v450_v46, %v437_v23  ;;  %v471_v26 = vmax.f32 %v463_v20, 0.0  ;;  %v465_v27 = vadd.f32 %v457_v21, %v413_v22  ;;  %v1915_v23 = vstv %s749_s12 }
  0xbc   : >> { %v464_v28 = vadd.f32 %v456_v25, %v412_v24  ;;  %1512 = vmatprep.mubr.f32.mxu0 %v471_v26  ;;  %v473_v31 = vmax.f32 %v465_v27, 0.0  ;;  %v1917_v24 = vstv %s1415_s0  ;;  %v1928_v27 = vstv %s1413_s15  ;;  %s2303_s15 = scalar_lea.vmem %s328_s25, %s1721_s10 }
  0xbe   : >> { %v393_v29 = vpop.permute.xlu1 %392  ;;  %v472_v30 = vmax.f32 %v464_v28, 0.0  ;;  %v1930_v28 = vstv %s1416_s17 }
  0xbf   : >> { %v406_v32 = vmul.f32 %v398_v45, %v393_v29 }
  0xc0   : >> { %1513 = vmatmul.mubr.f32.gmra.mxu0 %v472_v30 }
  0xc1   : >> { %1515 = vmatprep.mubr.f32.mxu0 %v473_v31  ;;  %v414_v33 = vadd.f32 %v1410_v49, %v406_v32  ;;  %v1942_v31 = vstv %s1414_s18  ;;  %v1944_v32 = vstv %s1417_s20 }
  0xc3   : >> { %v445_v34 = vpop.permute.xlu1 %444 }
  0xc4   : >> { %v458_v35 = vmul.f32 %v450_v46, %v445_v34 }
  0xc6   : >> { %v466_v36 = vadd.f32 %v458_v35, %v414_v33 }
  0xc8   : >> { %v474_v37 = vmax.f32 %v466_v36, 0.0 }
  0xca   : >> { %1516 = vmatmul.mubr.f32.gmra.mxu0 %v474_v37 }
 0x16f   : >> { %v1508_v43 = vpop.f32.mrf.mxu0 }
 0x170   : >> { %v570_v44 = vadd.f32 %v1508_v43, %v1411_v42 }
 0x171   : >> { %v564_v45 = vpop.f32.mrf.mxu0 }
 0x172   : >> { %v565_v46 = vadd.f32 %v1411_v42, %v564_v45  ;;  %v604_v49 = vmax.f32 %v570_v44, 0.0 }
 0x174   : >> { %v1511_v47 = vpop.f32.mrf.mxu0  ;;  %v603_v48 = vmax.f32 %v565_v46, 0.0 }
 0x175   : >> { %v580_v50 = vadd.f32 %v1511_v47, %v1411_v42 }
 0x176   : >> { %v574_v51 = vpop.f32.mrf.mxu0  ;;  %1550 = vmatprep.mubr.f32.mxu1 %v603_v48 }
 0x177   : >> { %v575_v52 = vadd.f32 %v1411_v42, %v574_v51  ;;  %1551 = vmatmul.mubr.f32.vlgmr.msra.gmra.mxu1 %v604_v49  ;;  %v606_v53 = vmax.f32 %v580_v50, 0.0 }
 0x179   : >> { %v605_v54 = vmax.f32 %v575_v52, 0.0 }
 0x17b   : >> { %1553 = vmatprep.mubr.f32.mxu1 %v605_v54 }
 0x17c   : >> { %1554 = vmatmul.mubr.f32.gmra.mxu1 %v606_v53 }
 0x180   : >> { %v1514_v55 = vpop.f32.mrf.mxu0 }
 0x181   : >> { %v590_v56 = vadd.f32 %v1514_v55, %v1411_v42 }
 0x182   : >> { %v584_v57 = vpop.f32.mrf.mxu0 }
 0x183   : >> { %v585_v58 = vadd.f32 %v1411_v42, %v584_v57  ;;  %v608_v60 = vmax.f32 %v590_v56, 0.0 }
 0x185   : >> { %v607_v59 = vmax.f32 %v585_v58, 0.0 }
 0x187   : >> { %1556 = vmatprep.mubr.f32.mxu1 %v607_v59 }
 0x188   : >> { %1557 = vmatmul.mubr.f32.gmra.mxu1 %v608_v60 }
 0x18a   : >> { %v1517_v61 = vpop.f32.mrf.mxu0 }
 0x18b   : >> { %v600_v62 = vadd.f32 %v1517_v61, %v1411_v42 }
 0x18c   : >> { %v594_v63 = vpop.f32.mrf.mxu0 }
 0x18d   : >> { %v595_v0 = vadd.f32 %v1411_v42, %v594_v63  ;;  %v610_v1 = vmax.f32 %v600_v62, 0.0 }
 0x18f   : >> { %v609_v2 = vmax.f32 %v595_v0, 0.0 }
 0x191   : >> { %1559 = vmatprep.mubr.f32.mxu1 %v609_v2 }
 0x192   : >> { %1560 = vmatmul.mubr.f32.gmra.mxu1 %v610_v1 }
 0x237   : >> { %v1552_v4 = vpop.f32.mrf.mxu1 }
 0x238   : >> { %v1853_v5 = vadd.f32 %v1552_v4, %v1412_v3 }
 0x239   : >> { %v700_v6 = vpop.f32.mrf.mxu1 }
 0x23a   : >> { %742 = vst.msk [vmem:[%s1851_s30 + $0x8] sm:$0xff] %vm740_vm0, %v1853_v5  ;;  %v1858_v7 = vadd.f32 %v1412_v3, %v700_v6  ;;  %765 = vrot.lane.b32.xlu0 %v1853_v5, %s1628_s11  ;;  %v2085_v6 = vstv %s1418_s13 }
 0x23c   : >> { %741 = vst.msk [vmem:[%s1851_s30] sm:$0xff] %vm740_vm0, %v1858_v7  ;;  %763 = vrot.lane.b32.xlu1 %v1858_v7, %s1628_s11  ;;  %v1555_v8 = vpop.f32.mrf.mxu1 }
 0x23d   : >> { %v1867_v9 = vadd.f32 %v1555_v8, %v1412_v3 }
 0x23e   : >> { %v710_v10 = vpop.f32.mrf.mxu1 }
 0x23f   : >> { %744 = vst.msk [vmem:[%s1851_s30 + $0x18] sm:$0xff] %vm740_vm0, %v1867_v9  ;;  %v1872_v11 = vadd.f32 %v1412_v3, %v710_v10  ;;  %769 = vrot.lane.b32.xlu0 %v1867_v9, %s1628_s11 }
 0x241   : >> { %743 = vst.msk [vmem:[%s1851_s30 + $0x10] sm:$0xff] %vm740_vm0, %v1872_v11  ;;  %767 = vrot.lane.b32.xlu1 %v1872_v11, %s1628_s11 }
 0x248   : >> { %v1558_v12 = vpop.f32.mrf.mxu1 }
 0x249   : >> { %v1881_v13 = vadd.f32 %v1558_v12, %v1412_v3 }
 0x24a   : >> { %v720_v14 = vpop.f32.mrf.mxu1 }
 0x24b   : >> { %746 = vst.msk [vmem:[%s1851_s30 + $0x28] sm:$0xff] %vm740_vm0, %v1881_v13  ;;  %v1886_v15 = vadd.f32 %v1412_v3, %v720_v14  ;;  %773 = vrot.lane.b32.xlu0 %v1881_v13, %s1628_s11 }
 0x24d   : >> { %745 = vst.msk [vmem:[%s1851_s30 + $0x20] sm:$0xff] %vm740_vm0, %v1886_v15  ;;  %771 = vrot.lane.b32.xlu1 %v1886_v15, %s1628_s11 }
 0x252   : >> { %v1561_v16 = vpop.f32.mrf.mxu1 }
 0x253   : >> { %v1895_v17 = vadd.f32 %v1561_v16, %v1412_v3  ;;  %v2096_v16 = vstv %s1419_s21 }
 0x254   : >> { %v730_v18 = vpop.f32.mrf.mxu1 }
 0x255   : >> { %748 = vst.msk [vmem:[%s1851_s30 + $0x38] sm:$0xff] %vm740_vm0, %v1895_v17  ;;  %v1900_v19 = vadd.f32 %v1412_v3, %v730_v18  ;;  %777 = vrot.lane.b32.xlu0 %v1895_v17, %s1628_s11 }
 0x257   : >> { %747 = vst.msk [vmem:[%s1851_s30 + $0x30] sm:$0xff] %vm740_vm0, %v1900_v19  ;;  %775 = vrot.lane.b32.xlu1 %v1900_v19, %s1628_s11  ;;  %s1630_s30 = smov 126  }
 0x2ac   : >> { %v766_v20 = vpop.permute.xlu0 %765 }
 0x2ad   : >> { %vm788_vm1 = vcmp.gt.f32.partialorder %v1853_v5, %v766_v20 }
 0x2ae   : >> { %v764_v21 = vpop.permute.xlu1 %763  ;;  %v796_v22 = vsel %vm788_vm1, %v1853_v5, %v766_v20  ;;  %v806_v26 = vsel %vm788_vm1, %v1917_v24, %v1915_v23  ;;  %v816_v30 = vsel %vm788_vm1, %v1930_v28, %v1928_v27  ;;  %v826_v36 = vsel %vm788_vm1, %v1944_v32, %v1942_v31 }
 0x2af   : >> { %vm787_vm2 = vcmp.gt.f32.partialorder %v1858_v7, %v764_v21  ;;  %843 = vrot.lane.b32.xlu0 %v796_v22, %s1628_s11 }
 0x2b0   : >> { %v795_v25 = vsel %vm787_vm2, %v1858_v7, %v764_v21  ;;  %v805_v29 = vsel %vm787_vm2, %v1917_v24, %v1915_v23  ;;  %v815_v34 = vsel %vm787_vm2, %v1930_v28, %v1928_v27  ;;  %v825_v37 = vsel %vm787_vm2, %v1944_v32, %v1942_v31 }
 0x2b1   : >> { %841 = vrot.lane.b32.xlu1 %v795_v25, %s1628_s11  ;;  %v770_v33 = vpop.permute.xlu0 %769 }
 0x2b2   : >> { %vm790_vm3 = vcmp.gt.f32.partialorder %v1867_v9, %v770_v33 }
 0x2b3   : >> { %893 = vrot.lane.b32.xlu0 %v806_v26, %s1628_s11  ;;  %v768_v35 = vpop.permute.xlu1 %767  ;;  %v798_v38 = vsel %vm790_vm3, %v1867_v9, %v770_v33  ;;  %v808_v40 = vsel %vm790_vm3, %v1917_v24, %v1915_v23  ;;  %v818_v42 = vsel %vm790_vm3, %v1930_v28, %v1928_v27  ;;  %v828_v46 = vsel %vm790_vm3, %v1944_v32, %v1942_v31 }
 0x2b4   : >> { %vm789_vm4 = vcmp.gt.f32.partialorder %v1872_v11, %v768_v35 }
 0x2b5   : >> { %891 = vrot.lane.b32.xlu1 %v805_v29, %s1628_s11  ;;  %v797_v39 = vsel %vm789_vm4, %v1872_v11, %v768_v35  ;;  %v807_v41 = vsel %vm789_vm4, %v1917_v24, %v1915_v23  ;;  %v817_v44 = vsel %vm789_vm4, %v1930_v28, %v1928_v27  ;;  %v827_v47 = vsel %vm789_vm4, %v1944_v32, %v1942_v31 }
 0x2b7   : >> { %935 = vrot.lane.b32.xlu0 %v816_v30, %s1628_s11 }
 0x2b9   : >> { %933 = vrot.lane.b32.xlu1 %v815_v34, %s1628_s11 }
 0x2bb   : >> { %977 = vrot.lane.b32.xlu0 %v826_v36, %s1628_s11 }
 0x2bd   : >> { %975 = vrot.lane.b32.xlu1 %v825_v37, %s1628_s11  ;;  %v774_v43 = vpop.permute.xlu0 %773 }
 0x2be   : >> { %vm792_vm5 = vcmp.gt.f32.partialorder %v1881_v13, %v774_v43 }
 0x2bf   : >> { %847 = vrot.lane.b32.xlu0 %v798_v38, %s1628_s11  ;;  %v772_v45 = vpop.permute.xlu1 %771  ;;  %v800_v48 = vsel %vm792_vm5, %v1881_v13, %v774_v43  ;;  %v810_v50 = vsel %vm792_vm5, %v1917_v24, %v1915_v23  ;;  %v820_v52 = vsel %vm792_vm5, %v1930_v28, %v1928_v27  ;;  %v830_v56 = vsel %vm792_vm5, %v1944_v32, %v1942_v31 }
 0x2c0   : >> { %vm791_vm6 = vcmp.gt.f32.partialorder %v1886_v15, %v772_v45 }
 0x2c1   : >> { %845 = vrot.lane.b32.xlu1 %v797_v39, %s1628_s11  ;;  %v799_v49 = vsel %vm791_vm6, %v1886_v15, %v772_v45  ;;  %v809_v51 = vsel %vm791_vm6, %v1917_v24, %v1915_v23  ;;  %v819_v54 = vsel %vm791_vm6, %v1930_v28, %v1928_v27  ;;  %v829_v57 = vsel %vm791_vm6, %v1944_v32, %v1942_v31 }
 0x2c3   : >> { %897 = vrot.lane.b32.xlu0 %v808_v40, %s1628_s11 }
 0x2c5   : >> { %895 = vrot.lane.b32.xlu1 %v807_v41, %s1628_s11 }
 0x2c7   : >> { %939 = vrot.lane.b32.xlu0 %v818_v42, %s1628_s11  ;;  %v778_v53 = vpop.permute.xlu0 %777 }
 0x2c8   : >> { %vm794_vm7 = vcmp.gt.f32.partialorder %v1895_v17, %v778_v53 }
 0x2c9   : >> { %937 = vrot.lane.b32.xlu1 %v817_v44, %s1628_s11  ;;  %v776_v55 = vpop.permute.xlu1 %775  ;;  %v802_v58 = vsel %vm794_vm7, %v1895_v17, %v778_v53  ;;  %v812_v60 = vsel %vm794_vm7, %v1917_v24, %v1915_v23  ;;  %v822_v62 = vsel %vm794_vm7, %v1930_v28, %v1928_v27  ;;  %v832_v0 = vsel %vm794_vm7, %v1944_v32, %v1942_v31 }
 0x2ca   : >> { %vm793_vm8 = vcmp.gt.f32.partialorder %v1900_v19, %v776_v55 }
 0x2cb   : >> { %981 = vrot.lane.b32.xlu0 %v828_v46, %s1628_s11  ;;  %v801_v59 = vsel %vm793_vm8, %v1900_v19, %v776_v55  ;;  %v811_v61 = vsel %vm793_vm8, %v1917_v24, %v1915_v23  ;;  %v821_v63 = vsel %vm793_vm8, %v1930_v28, %v1928_v27  ;;  %v831_v1 = vsel %vm793_vm8, %v1944_v32, %v1942_v31 }
 0x2cc   : >> { %v2106_v23 = vstv %s1420_s23 }
 0x2cd   : >> { %979 = vrot.lane.b32.xlu1 %v827_v47, %s1628_s11 }
 0x2cf   : >> { %851 = vrot.lane.b32.xlu0 %v800_v48, %s1628_s11 }
 0x2d1   : >> { %849 = vrot.lane.b32.xlu1 %v799_v49, %s1628_s11 }
 0x2d3   : >> { %901 = vrot.lane.b32.xlu0 %v810_v50, %s1628_s11 }
 0x2d5   : >> { %899 = vrot.lane.b32.xlu1 %v809_v51, %s1628_s11 }
 0x2d7   : >> { %943 = vrot.lane.b32.xlu0 %v820_v52, %s1628_s11 }
 0x2d9   : >> { %941 = vrot.lane.b32.xlu1 %v819_v54, %s1628_s11 }
 0x2db   : >> { %985 = vrot.lane.b32.xlu0 %v830_v56, %s1628_s11 }
 0x2dd   : >> { %983 = vrot.lane.b32.xlu1 %v829_v57, %s1628_s11 }
 0x2df   : >> { %855 = vrot.lane.b32.xlu0 %v802_v58, %s1628_s11 }
 0x2e1   : >> { %853 = vrot.lane.b32.xlu1 %v801_v59, %s1628_s11 }
 0x2e3   : >> { %905 = vrot.lane.b32.xlu0 %v812_v60, %s1628_s11 }
 0x2e5   : >> { %903 = vrot.lane.b32.xlu1 %v811_v61, %s1628_s11 }
 0x2e7   : >> { %947 = vrot.lane.b32.xlu0 %v822_v62, %s1628_s11 }
 0x2e9   : >> { %945 = vrot.lane.b32.xlu1 %v821_v63, %s1628_s11 }
 0x2eb   : >> { %989 = vrot.lane.b32.xlu0 %v832_v0, %s1628_s11 }
 0x2ed   : >> { %987 = vrot.lane.b32.xlu1 %v831_v1, %s1628_s11 }
 0x321   : >> { %v844_v2 = vpop.permute.xlu0 %843 }
 0x322   : >> { %vm866_vm9 = vcmp.gt.f32.partialorder %v1853_v5, %v844_v2 }
 0x323   : >> { %v842_v3 = vpop.permute.xlu1 %841  ;;  %v874_v4 = vsel %vm866_vm9, %v1853_v5, %v844_v2 }
 0x324   : >> { %vm865_vm10 = vcmp.gt.f32.partialorder %v1858_v7, %v842_v3  ;;  %1017 = vrot.lane.b32.xlu0 %v874_v4, %s1628_s11 }
 0x325   : >> { %v894_v8 = vpop.permute.xlu0 %893  ;;  %v873_v10 = vsel %vm865_vm10, %v1858_v7, %v842_v3 }
 0x326   : >> { %1015 = vrot.lane.b32.xlu1 %v873_v10, %s1628_s11  ;;  %v916_v12 = vsel %vm866_vm9, %v2085_v6, %v894_v8 }
 0x327   : >> { %v892_v14 = vpop.permute.xlu1 %891 }
 0x328   : >> { %1059 = vrot.lane.b32.xlu0 %v916_v12, %s1628_s11  ;;  %v915_v18 = vsel %vm865_vm10, %v2085_v6, %v892_v14 }
 0x329   : >> { %v936_v20 = vpop.permute.xlu0 %935 }
 0x32a   : >> { %1057 = vrot.lane.b32.xlu1 %v915_v18, %s1628_s11  ;;  %v958_v21 = vsel %vm866_vm9, %v2096_v16, %v936_v20 }
 0x32b   : >> { %v934_v22 = vpop.permute.xlu1 %933 }
 0x32c   : >> { %1101 = vrot.lane.b32.xlu0 %v958_v21, %s1628_s11  ;;  %v957_v24 = vsel %vm865_vm10, %v2096_v16, %v934_v22 }
 0x32d   : >> { %v978_v25 = vpop.permute.xlu0 %977 }
 0x32e   : >> { %1099 = vrot.lane.b32.xlu1 %v957_v24, %s1628_s11  ;;  %v1000_v26 = vsel %vm866_vm9, %v2106_v23, %v978_v25  ;;  %v2223_v24 = vstv %s1421_s24  ;;  %vm1269_vm9 = vcmask 7168  }
 0x32f   : >> { %v976_v27 = vpop.permute.xlu1 %975 }
 0x330   : >> { %1143 = vrot.lane.b32.xlu0 %v1000_v26, %s1628_s11  ;;  %v999_v28 = vsel %vm865_vm10, %v2106_v23, %v976_v27  ;;  %v2231_v27 = vstv %s1422_s27  ;;  %vm1278_vm10 = vcmask 15360  }
 0x331   : >> { %v848_v29 = vpop.permute.xlu0 %847 }
 0x332   : >> { %vm868_vm11 = vcmp.gt.f32.partialorder %v1867_v9, %v848_v29  ;;  %1141 = vrot.lane.b32.xlu1 %v999_v28, %s1628_s11 }
 0x333   : >> { %v846_v30 = vpop.permute.xlu1 %845  ;;  %v876_v31 = vsel %vm868_vm11, %v1867_v9, %v848_v29 }
 0x334   : >> { %vm867_vm12 = vcmp.gt.f32.partialorder %v1872_v11, %v846_v30  ;;  %1021 = vrot.lane.b32.xlu0 %v876_v31, %s1628_s11 }
 0x335   : >> { %v898_v32 = vpop.permute.xlu0 %897  ;;  %v875_v33 = vsel %vm867_vm12, %v1872_v11, %v846_v30 }
 0x336   : >> { %1019 = vrot.lane.b32.xlu1 %v875_v33, %s1628_s11  ;;  %v918_v34 = vsel %vm868_vm11, %v2085_v6, %v898_v32  ;;  %v2241_v32 = vstv %s1423_s28 }
 0x337   : >> { %v896_v35 = vpop.permute.xlu1 %895 }
 0x338   : >> { %1063 = vrot.lane.b32.xlu0 %v918_v34, %s1628_s11  ;;  %v917_v36 = vsel %vm867_vm12, %v2085_v6, %v896_v35 }
 0x339   : >> { %v940_v37 = vpop.permute.xlu0 %939 }
 0x33a   : >> { %1061 = vrot.lane.b32.xlu1 %v917_v36, %s1628_s11  ;;  %v960_v38 = vsel %vm868_vm11, %v2096_v16, %v940_v37 }
 0x33b   : >> { %v938_v39 = vpop.permute.xlu1 %937 }
 0x33c   : >> { %1105 = vrot.lane.b32.xlu0 %v960_v38, %s1628_s11  ;;  %v959_v40 = vsel %vm867_vm12, %v2096_v16, %v938_v39 }
 0x33d   : >> { %v982_v41 = vpop.permute.xlu0 %981 }
 0x33e   : >> { %1103 = vrot.lane.b32.xlu1 %v959_v40, %s1628_s11  ;;  %v1002_v42 = vsel %vm868_vm11, %v2106_v23, %v982_v41  ;;  %vm1288_vm11 = vcmask 23552  }
 0x33f   : >> { %v980_v43 = vpop.permute.xlu1 %979 }
 0x340   : >> { %1147 = vrot.lane.b32.xlu0 %v1002_v42, %s1628_s11  ;;  %v1001_v44 = vsel %vm867_vm12, %v2106_v23, %v980_v43 }
 0x341   : >> { %v852_v45 = vpop.permute.xlu0 %851 }
 0x342   : >> { %vm870_vm13 = vcmp.gt.f32.partialorder %v1881_v13, %v852_v45  ;;  %1145 = vrot.lane.b32.xlu1 %v1001_v44, %s1628_s11 }
 0x343   : >> { %v850_v46 = vpop.permute.xlu1 %849  ;;  %v878_v47 = vsel %vm870_vm13, %v1881_v13, %v852_v45 }
 0x344   : >> { %vm869_vm14 = vcmp.gt.f32.partialorder %v1886_v15, %v850_v46  ;;  %1025 = vrot.lane.b32.xlu0 %v878_v47, %s1628_s11 }
 0x345   : >> { %v902_v48 = vpop.permute.xlu0 %901  ;;  %v877_v49 = vsel %vm869_vm14, %v1886_v15, %v850_v46 }
 0x346   : >> { %1023 = vrot.lane.b32.xlu1 %v877_v49, %s1628_s11  ;;  %v920_v50 = vsel %vm870_vm13, %v2085_v6, %v902_v48 }
 0x347   : >> { %v900_v51 = vpop.permute.xlu1 %899 }
 0x348   : >> { %1067 = vrot.lane.b32.xlu0 %v920_v50, %s1628_s11  ;;  %v919_v52 = vsel %vm869_vm14, %v2085_v6, %v900_v51 }
 0x349   : >> { %v944_v53 = vpop.permute.xlu0 %943 }
 0x34a   : >> { %1065 = vrot.lane.b32.xlu1 %v919_v52, %s1628_s11  ;;  %v962_v54 = vsel %vm870_vm13, %v2096_v16, %v944_v53 }
 0x34b   : >> { %v942_v55 = vpop.permute.xlu1 %941 }
 0x34c   : >> { %1109 = vrot.lane.b32.xlu0 %v962_v54, %s1628_s11  ;;  %v961_v56 = vsel %vm869_vm14, %v2096_v16, %v942_v55 }
 0x34d   : >> { %v986_v57 = vpop.permute.xlu0 %985 }
 0x34e   : >> { %1107 = vrot.lane.b32.xlu1 %v961_v56, %s1628_s11  ;;  %v1004_v58 = vsel %vm870_vm13, %v2106_v23, %v986_v57 }
 0x34f   : >> { %v984_v59 = vpop.permute.xlu1 %983 }
 0x350   : >> { %1151 = vrot.lane.b32.xlu0 %v1004_v58, %s1628_s11  ;;  %v1003_v60 = vsel %vm869_vm14, %v2106_v23, %v984_v59 }
 0x351   : >> { %v856_v61 = vpop.permute.xlu0 %855 }
 0x352   : >> { %vm872_vm15 = vcmp.gt.f32.partialorder %v1895_v17, %v856_v61  ;;  %1149 = vrot.lane.b32.xlu1 %v1003_v60, %s1628_s11 }
 0x353   : >> { %v854_v62 = vpop.permute.xlu1 %853  ;;  %v880_v63 = vsel %vm872_vm15, %v1895_v17, %v856_v61 }
 0x354   : >> { %vm871_vm0 = vcmp.gt.f32.partialorder %v1900_v19, %v854_v62  ;;  %1029 = vrot.lane.b32.xlu0 %v880_v63, %s1628_s11 }
 0x355   : >> { %v906_v0 = vpop.permute.xlu0 %905  ;;  %v879_v1 = vsel %vm871_vm0, %v1900_v19, %v854_v62 }
 0x356   : >> { %1027 = vrot.lane.b32.xlu1 %v879_v1, %s1628_s11  ;;  %v922_v2 = vsel %vm872_vm15, %v2085_v6, %v906_v0 }
 0x357   : >> { %v904_v3 = vpop.permute.xlu1 %903 }
 0x358   : >> { %1071 = vrot.lane.b32.xlu0 %v922_v2, %s1628_s11  ;;  %v921_v4 = vsel %vm871_vm0, %v2085_v6, %v904_v3 }
 0x359   : >> { %v948_v8 = vpop.permute.xlu0 %947 }
 0x35a   : >> { %1069 = vrot.lane.b32.xlu1 %v921_v4, %s1628_s11  ;;  %v964_v10 = vsel %vm872_vm15, %v2096_v16, %v948_v8 }
 0x35b   : >> { %v946_v12 = vpop.permute.xlu1 %945 }
 0x35c   : >> { %1113 = vrot.lane.b32.xlu0 %v964_v10, %s1628_s11  ;;  %v963_v14 = vsel %vm871_vm0, %v2096_v16, %v946_v12 }
 0x35d   : >> { %v990_v18 = vpop.permute.xlu0 %989 }
 0x35e   : >> { %1111 = vrot.lane.b32.xlu1 %v963_v14, %s1628_s11  ;;  %v1006_v6 = vsel %vm872_vm15, %v2106_v23, %v990_v18 }
 0x35f   : >> { %v988_v20 = vpop.permute.xlu1 %987 }
 0x360   : >> { %1155 = vrot.lane.b32.xlu0 %v1006_v6, %s1628_s11  ;;  %v1005_v21 = vsel %vm871_vm0, %v2106_v23, %v988_v20 }
 0x362   : >> { %1153 = vrot.lane.b32.xlu1 %v1005_v21, %s1628_s11  ;;  %s1631_s11 = smov 127  }
 0x396   : >> { %v1018_v22 = vpop.permute.xlu0 %1017 }
 0x397   : >> { %vm1040_vm1 = vcmp.gt.f32.partialorder %v1853_v5, %v1018_v22 }
 0x398   : >> { %v1016_v16 = vpop.permute.xlu1 %1015 }
 0x399   : >> { %vm1039_vm2 = vcmp.gt.f32.partialorder %v1858_v7, %v1016_v16 }
 0x39a   : >> { %v1060_v25 = vpop.permute.xlu0 %1059 }
 0x39b   : >> { %v1082_v26 = vsel %vm1040_vm1, %v2223_v24, %v1060_v25 }
 0x39c   : >> { %1183 = vrot.lane.b32.xlu0 %v1082_v26, %s1629_s29  ;;  %v1058_v23 = vpop.permute.xlu1 %1057 }
 0x39d   : >> { %v1081_v28 = vsel %vm1039_vm2, %v2223_v24, %v1058_v23 }
 0x39e   : >> { %v1102_v29 = vpop.permute.xlu0 %1101  ;;  %1181 = vrot.lane.b32.xlu1 %v1081_v28, %s1629_s29 }
 0x39f   : >> { %v1124_v30 = vsel %vm1040_vm1, %v2231_v27, %v1102_v29 }
 0x3a0   : >> { %1215 = vrot.lane.b32.xlu0 %v1124_v30, %s1630_s30  ;;  %v1100_v31 = vpop.permute.xlu1 %1099 }
 0x3a1   : >> { %v1123_v33 = vsel %vm1039_vm2, %v2231_v27, %v1100_v31 }
 0x3a2   : >> { %v1144_v34 = vpop.permute.xlu0 %1143  ;;  %1213 = vrot.lane.b32.xlu1 %v1123_v33, %s1630_s30 }
 0x3a3   : >> { %v1166_v35 = vsel %vm1040_vm1, %v2241_v32, %v1144_v34 }
 0x3a4   : >> { %1247 = vrot.lane.b32.xlu0 %v1166_v35, %s1631_s11  ;;  %v1142_v36 = vpop.permute.xlu1 %1141 }
 0x3a5   : >> { %v1165_v37 = vsel %vm1039_vm2, %v2241_v32, %v1142_v36 }
 0x3a6   : >> { %v1022_v38 = vpop.permute.xlu0 %1021  ;;  %1245 = vrot.lane.b32.xlu1 %v1165_v37, %s1631_s11 }
 0x3a7   : >> { %vm1042_vm3 = vcmp.gt.f32.partialorder %v1867_v9, %v1022_v38 }
 0x3a8   : >> { %v1020_v39 = vpop.permute.xlu1 %1019 }
 0x3a9   : >> { %vm1041_vm4 = vcmp.gt.f32.partialorder %v1872_v11, %v1020_v39 }
 0x3aa   : >> { %v1064_v40 = vpop.permute.xlu0 %1063 }
 0x3ab   : >> { %v1084_v41 = vsel %vm1042_vm3, %v2223_v24, %v1064_v40 }
 0x3ac   : >> { %1187 = vrot.lane.b32.xlu0 %v1084_v41, %s1629_s29  ;;  %v1062_v5 = vpop.permute.xlu1 %1061 }
 0x3ad   : >> { %v1083_v42 = vsel %vm1041_vm4, %v2223_v24, %v1062_v5 }
 0x3ae   : >> { %v1106_v43 = vpop.permute.xlu0 %1105  ;;  %1185 = vrot.lane.b32.xlu1 %v1083_v42, %s1629_s29 }
 0x3af   : >> { %v1126_v7 = vsel %vm1042_vm3, %v2231_v27, %v1106_v43 }
 0x3b0   : >> { %1219 = vrot.lane.b32.xlu0 %v1126_v7, %s1630_s30  ;;  %v1104_v44 = vpop.permute.xlu1 %1103 }
 0x3b1   : >> { %v1125_v9 = vsel %vm1041_vm4, %v2231_v27, %v1104_v44 }
 0x3b2   : >> { %v1148_v45 = vpop.permute.xlu0 %1147  ;;  %1217 = vrot.lane.b32.xlu1 %v1125_v9, %s1630_s30 }
 0x3b3   : >> { %v1168_v11 = vsel %vm1042_vm3, %v2241_v32, %v1148_v45 }
 0x3b4   : >> { %1251 = vrot.lane.b32.xlu0 %v1168_v11, %s1631_s11  ;;  %v1146_v46 = vpop.permute.xlu1 %1145 }
 0x3b5   : >> { %v1167_v47 = vsel %vm1041_vm4, %v2241_v32, %v1146_v46 }
 0x3b6   : >> { %v1026_v48 = vpop.permute.xlu0 %1025  ;;  %1249 = vrot.lane.b32.xlu1 %v1167_v47, %s1631_s11 }
 0x3b7   : >> { %vm1044_vm5 = vcmp.gt.f32.partialorder %v1881_v13, %v1026_v48 }
 0x3b8   : >> { %v1024_v49 = vpop.permute.xlu1 %1023 }
 0x3b9   : >> { %vm1043_vm6 = vcmp.gt.f32.partialorder %v1886_v15, %v1024_v49 }
 0x3ba   : >> { %v1068_v50 = vpop.permute.xlu0 %1067 }
 0x3bb   : >> { %v1086_v51 = vsel %vm1044_vm5, %v2223_v24, %v1068_v50 }
 0x3bc   : >> { %1191 = vrot.lane.b32.xlu0 %v1086_v51, %s1629_s29  ;;  %v1066_v52 = vpop.permute.xlu1 %1065 }
 0x3bd   : >> { %v1085_v53 = vsel %vm1043_vm6, %v2223_v24, %v1066_v52 }
 0x3be   : >> { %v1110_v54 = vpop.permute.xlu0 %1109  ;;  %1189 = vrot.lane.b32.xlu1 %v1085_v53, %s1629_s29 }
 0x3bf   : >> { %v1128_v55 = vsel %vm1044_vm5, %v2231_v27, %v1110_v54 }
 0x3c0   : >> { %1223 = vrot.lane.b32.xlu0 %v1128_v55, %s1630_s30  ;;  %v1108_v56 = vpop.permute.xlu1 %1107 }
 0x3c1   : >> { %v1127_v13 = vsel %vm1043_vm6, %v2231_v27, %v1108_v56 }
 0x3c2   : >> { %v1152_v57 = vpop.permute.xlu0 %1151  ;;  %1221 = vrot.lane.b32.xlu1 %v1127_v13, %s1630_s30 }
 0x3c3   : >> { %v1170_v15 = vsel %vm1044_vm5, %v2241_v32, %v1152_v57 }
 0x3c4   : >> { %1255 = vrot.lane.b32.xlu0 %v1170_v15, %s1631_s11  ;;  %v1150_v58 = vpop.permute.xlu1 %1149 }
 0x3c5   : >> { %v1169_v59 = vsel %vm1043_vm6, %v2241_v32, %v1150_v58 }
 0x3c6   : >> { %v1030_v60 = vpop.permute.xlu0 %1029  ;;  %1253 = vrot.lane.b32.xlu1 %v1169_v59, %s1631_s11 }
 0x3c7   : >> { %vm1046_vm7 = vcmp.gt.f32.partialorder %v1895_v17, %v1030_v60 }
 0x3c8   : >> { %v1028_v61 = vpop.permute.xlu1 %1027 }
 0x3c9   : >> { %vm1045_vm8 = vcmp.gt.f32.partialorder %v1900_v19, %v1028_v61 }
 0x3ca   : >> { %v1072_v62 = vpop.permute.xlu0 %1071 }
 0x3cb   : >> { %v1088_v63 = vsel %vm1046_vm7, %v2223_v24, %v1072_v62 }
 0x3cc   : >> { %1195 = vrot.lane.b32.xlu0 %v1088_v63, %s1629_s29  ;;  %v1070_v0 = vpop.permute.xlu1 %1069 }
 0x3cd   : >> { %v1087_v1 = vsel %vm1045_vm8, %v2223_v24, %v1070_v0 }
 0x3ce   : >> { %v1114_v2 = vpop.permute.xlu0 %1113  ;;  %1193 = vrot.lane.b32.xlu1 %v1087_v1, %s1629_s29 }
 0x3cf   : >> { %v1130_v3 = vsel %vm1046_vm7, %v2231_v27, %v1114_v2 }
 0x3d0   : >> { %1227 = vrot.lane.b32.xlu0 %v1130_v3, %s1630_s30  ;;  %v1112_v17 = vpop.permute.xlu1 %1111 }
 0x3d1   : >> { %v1129_v4 = vsel %vm1045_vm8, %v2231_v27, %v1112_v17 }
 0x3d2   : >> { %v1156_v8 = vpop.permute.xlu0 %1155  ;;  %1225 = vrot.lane.b32.xlu1 %v1129_v4, %s1630_s30 }
 0x3d3   : >> { %v1172_v19 = vsel %vm1046_vm7, %v2241_v32, %v1156_v8 }
 0x3d4   : >> { %1259 = vrot.lane.b32.xlu0 %v1172_v19, %s1631_s11  ;;  %v1154_v10 = vpop.permute.xlu1 %1153 }
 0x3d5   : >> { %v1171_v12 = vsel %vm1045_vm8, %v2241_v32, %v1154_v10 }
 0x3d6   : >> { %1257 = vrot.lane.b32.xlu1 %v1171_v12, %s1631_s11 }
 0x40e   : >> { %v1184_v14 = vpop.permute.xlu0 %1183 }
 0x410   : >> { %v1182_v18 = vpop.permute.xlu1 %1181 }
 0x412   : >> { %v1216_v6 = vpop.permute.xlu0 %1215 }
 0x413   : >> { %v1271_v21 = vsel %vm1269_vm9, %v1184_v14, %v1216_v6 }
 0x414   : >> { %v1214_v20 = vpop.permute.xlu1 %1213 }
 0x415   : >> { %v1270_v24 = vsel %vm1269_vm9, %v1182_v18, %v1214_v20 }
 0x416   : >> { %v1248_v22 = vpop.permute.xlu0 %1247 }
 0x417   : >> { %v1280_v16 = vsel %vm1278_vm10, %v1271_v21, %v1248_v22 }
 0x418   : >> { %1290 = vst.msk [vmem:[%s2303_s15 + $0x8] sm:$0xff] %vm1288_vm11, %v1280_v16  ;;  %v1246_v25 = vpop.permute.xlu1 %1245 }
 0x419   : >> { %v1279_v26 = vsel %vm1278_vm10, %v1270_v24, %v1246_v25 }
 0x41a   : >> { %1289 = vst.msk [vmem:[%s2303_s15] sm:$0xff] %vm1288_vm11, %v1279_v26 }
 0x41e   : >> { %v1188_v23 = vpop.permute.xlu0 %1187 }
 0x420   : >> { %v1186_v27 = vpop.permute.xlu1 %1185 }
 0x422   : >> { %v1220_v28 = vpop.permute.xlu0 %1219 }
 0x423   : >> { %v1273_v30 = vsel %vm1269_vm9, %v1188_v23, %v1220_v28 }
 0x424   : >> { %v1218_v29 = vpop.permute.xlu1 %1217 }
 0x425   : >> { %v1272_v33 = vsel %vm1269_vm9, %v1186_v27, %v1218_v29 }
 0x426   : >> { %v1252_v31 = vpop.permute.xlu0 %1251 }
 0x427   : >> { %v1282_v32 = vsel %vm1278_vm10, %v1273_v30, %v1252_v31 }
 0x428   : >> { %1292 = vst.msk [vmem:[%s2303_s15 + $0x18] sm:$0xff] %vm1288_vm11, %v1282_v32  ;;  %v1250_v34 = vpop.permute.xlu1 %1249 }
 0x429   : >> { %v1281_v35 = vsel %vm1278_vm10, %v1272_v33, %v1250_v34 }
 0x42a   : >> { %1291 = vst.msk [vmem:[%s2303_s15 + $0x10] sm:$0xff] %vm1288_vm11, %v1281_v35 }
 0x42e   : >> { %v1192_v36 = vpop.permute.xlu0 %1191 }
 0x430   : >> { %v1190_v37 = vpop.permute.xlu1 %1189 }
 0x432   : >> { %v1224_v38 = vpop.permute.xlu0 %1223 }
 0x433   : >> { %v1275_v40 = vsel %vm1269_vm9, %v1192_v36, %v1224_v38 }
 0x434   : >> { %v1222_v39 = vpop.permute.xlu1 %1221 }
 0x435   : >> { %v1274_v42 = vsel %vm1269_vm9, %v1190_v37, %v1222_v39 }
 0x436   : >> { %v1256_v41 = vpop.permute.xlu0 %1255 }
 0x437   : >> { %v1284_v5 = vsel %vm1278_vm10, %v1275_v40, %v1256_v41 }
 0x438   : >> { %1294 = vst.msk [vmem:[%s2303_s15 + $0x28] sm:$0xff] %vm1288_vm11, %v1284_v5  ;;  %v1254_v43 = vpop.permute.xlu1 %1253 }
 0x439   : >> { %v1283_v7 = vsel %vm1278_vm10, %v1274_v42, %v1254_v43 }
 0x43a   : >> { %1293 = vst.msk [vmem:[%s2303_s15 + $0x20] sm:$0xff] %vm1288_vm11, %v1283_v7 }
 0x43e   : >> { %v1196_v44 = vpop.permute.xlu0 %1195 }
 0x440   : >> { %v1194_v9 = vpop.permute.xlu1 %1193 }
 0x442   : >> { %v1228_v45 = vpop.permute.xlu0 %1227 }
 0x443   : >> { %v1277_v46 = vsel %vm1269_vm9, %v1196_v44, %v1228_v45 }
 0x444   : >> { %v1226_v11 = vpop.permute.xlu1 %1225 }
 0x445   : >> { %v1276_v49 = vsel %vm1269_vm9, %v1194_v9, %v1226_v11 }
 0x446   : >> { %v1260_v47 = vpop.permute.xlu0 %1259  ;;  %334 = sbr.rel (!%p332_p9) target bundleno = 30 (0x1e), region = 100 }
 0x447   : >> { %v1286_v48 = vsel %vm1278_vm10, %v1277_v46, %v1260_v47 }
 0x448   : >> { %1296 = vst.msk [vmem:[%s2303_s15 + $0x38] sm:$0xff] %vm1288_vm11, %v1286_v48  ;;  %v1258_v50 = vpop.permute.xlu1 %1257 }
 0x449   : >> { %v1285_v51 = vsel %vm1278_vm10, %v1276_v49, %v1258_v50 }
 0x44a   : >> { %1295 = vst.msk [vmem:[%s2303_s15 + $0x30] sm:$0xff] %vm1288_vm11, %v1285_v51 }
 0x44b PF: > { %s26_s14 = sadd.s32 1, %s1619_s14  }
 0x44c   : > { %p23_p10 = scmp.ge.s32.totalorder %s26_s14, 4  }
 0x44e   :  { %25 = sbr.rel (!%p23_p10) target bundleno = 16 (0x10), region = 111 }

</bundles_post_ra>
